<compile_context>
chip_gen: v6e
topology: v6e:2x2x1
jax: 0.10.0
libtpu: 0.0.40
codegen_flags: <defaults>
</compile_context>

<pallas_src>
import numpy as np
import jax
import jax.numpy as jnp
from jax.experimental import pallas as pl
from jax.experimental.pallas import tpu as pltpu

_LANES = 128                          # vreg lane width; lane-dense last dim => unmasked vst
_SMALL_PATH_MAX_ELEMS = 512 * 1024    # <= 2 MiB f32: single-block path, no wrapper copies


def _model_tanh_kernel(scal_ref, x_ref, o_ref):
    # scal_ref: SMEM (3,) float32 = [conv_weight, conv_bias, b2]
    w = scal_ref[0]
    b = scal_ref[1]
    b2 = scal_ref[2]
    x = x_ref[...]
    v1 = x * w + b                      # 1x1 conv (1->1 channel) == scalar affine (VPU)
    v2 = jnp.tanh(v1)                   # EUP slot; hidden under the HBM roofline
    v3 = v2 * jnp.float32(81.0) + b2    # b1 = 3 ** 4
    o_ref[...] = v3 / v3                # keep the real divide: NaN where v3 == 0


def _compute_b2(x_np, n):
    # b2 = len(set(str(x))) - x.size(0): host-side python scalar over the array's repr.
    # TODO(synk): numpy's str() formatting ('...' truncation, float repr) differs from
    # torch's str(tensor), so b2 may not match PyTorch bit-for-bit for all inputs.
    return float(len(set(str(x_np))) - n)


def _round8_down(v):
    return max(8, (int(v) // 8) * 8)


def _round8_up(v):
    return max(8, ((int(v) + 7) // 8) * 8)


def model_tanh_forward(x, conv_w, conv_b, b2=None, tile_rows=2048):
    """x: (N, 1, H, W) float32. conv_w / conv_b: python scalars. b2: optional host scalar."""
    n, c, h, w = x.shape
    assert c == 1, "Conv2d(1, 1, 1) requires a single input channel"

    if b2 is None:
        # Fallback: forces a device->host transfer; prefer passing b2 precomputed.
        b2 = _compute_b2(np.asarray(x), n)

    scal = jnp.array([conv_w, conv_b, b2], dtype=jnp.float32)
    total = n * c * h * w

    if total <= _SMALL_PATH_MAX_ELEMS:
        # Small-input fast path: original 4D array as a single full-array block.
        # No flatten / pad / slice wrapper copies, no grid machinery.
        return pl.pallas_call(
            _model_tanh_kernel,
            out_shape=jax.ShapeDtypeStruct(x.shape, x.dtype),
            grid=(1,),
            in_specs=[
                pl.BlockSpec(memory_space=pltpu.MemorySpace.SMEM),       # scalars
                pl.BlockSpec(x.shape, lambda i: (0, 0, 0, 0)),           # whole array
            ],
            out_specs=pl.BlockSpec(x.shape, lambda i: (0, 0, 0, 0)),
        )(scal, x)

    # Large-input path: lane-dense (rows, 128) streaming kernel.
    rows = pl.cdiv(total, _LANES)
    pad = rows * _LANES - total          # <= 127 elements; 0 when total % 128 == 0
    x_flat = x.reshape(-1)
    if pad:
        x_flat = jnp.pad(x_flat, (0, pad))
    x2d = x_flat.reshape(rows, _LANES)

    # tile_r: multiple of 8 (sublane rule), default 2048 rows => 1 MiB f32 block.
    tile_r = _round8_down(min(int(tile_rows), rows))
    # Guarantee >= 2 grid steps so "parallel" megacore sharding has work for both TCs.
    if rows >= 16:
        tile_r = min(tile_r, _round8_up(pl.cdiv(rows, 2)))
    grid = (pl.cdiv(rows, tile_r),)      # ragged last block: OOB writes are discarded

    cost = pl.CostEstimate(
        flops=5 * total,
        transcendentals=total,
        bytes_accessed=2 * total * 4,
    )

    out2d = pl.pallas_call(
        _model_tanh_kernel,
        out_shape=jax.ShapeDtypeStruct((rows, _LANES), x.dtype),
        grid=grid,
        in_specs=[
            pl.BlockSpec(memory_space=pltpu.MemorySpace.SMEM),           # scalars
            pl.BlockSpec((tile_r, _LANES), lambda i: (i, 0)),            # x tiles
        ],
        out_specs=pl.BlockSpec((tile_r, _LANES), lambda i: (i, 0)),
        compiler_params=pltpu.CompilerParams(
            dimension_semantics=("parallel",),   # shards tiles across TCs on v7x megacore
        ),
        cost_estimate=cost,
    )(scal, x2d)

    out_flat = out2d.reshape(-1)
    if pad:
        out_flat = out_flat[:total]      # drop the <=127-element lane pad
    return out_flat.reshape(n, c, h, w)


def _reference(x, conv_w, conv_b, b2):
    v3 = jnp.tanh(x * conv_w + conv_b) * 81.0 + b2
    return v3 / v3


if __name__ == "__main__":
    key = jax.random.PRNGKey(0)
    kx1, kx2, kw, kb = jax.random.split(key, 4)

    # Deterministic Conv2d(1,1,1) parameters.
    conv_w = float(jax.random.uniform(kw, (), minval=-1.0, maxval=1.0))
    conv_b = float(jax.random.uniform(kb, (), minval=-1.0, maxval=1.0))

    # Test 1: small shape consistent with the module (N=2, C=1, H=15, W=26)
    # -> exercises the single-block small-input fast path.
    x_small = jax.random.normal(kx1, (2, 1, 15, 26), dtype=jnp.float32)
    b2_small = _compute_b2(np.asarray(x_small), x_small.shape[0])
    out_small = jax.block_until_ready(
        model_tanh_forward(x_small, conv_w, conv_b, b2=b2_small))
    ref_small = _reference(x_small, conv_w, conv_b, b2_small)
    np.testing.assert_allclose(
        np.asarray(out_small), np.asarray(ref_small), rtol=1e-6, atol=1e-6)

    # Test 2: larger input -> exercises the gridded lane-dense path with a
    # non-multiple-of-128 total (<=127-elem pad) and a ragged last block.
    x_big = jax.random.normal(kx2, (9, 1, 255, 255), dtype=jnp.float32)
    b2_big = _compute_b2(np.asarray(x_big), x_big.shape[0])
    out_big = jax.block_until_ready(
        model_tanh_forward(x_big, conv_w, conv_b, b2=b2_big))
    ref_big = _reference(x_big, conv_w, conv_b, b2_big)
    np.testing.assert_allclose(
        np.asarray(out_big), np.asarray(ref_big), rtol=1e-6, atol=1e-6)

    print("KERNEL_OK")
</pallas_src>

<mosaic_0001>
module attributes {stable_mosaic.version = 11 : i64} {
  func.func @_model_tanh_kernel(%arg0: i32, %arg1: memref<3xf32, #tpu.memory_space<smem>>, %arg2: memref<2x1x15x26xf32, #tpu.memory_space<vmem>>, %arg3: memref<2x1x15x26xf32, #tpu.memory_space<vmem>>) attributes {dimension_semantics = [#tpu.dimension_semantics<arbitrary>], iteration_bounds = array<i64: 1>, scalar_prefetch = 0 : i64, scratch_operands = 0 : i64, tpu.core_type = #tpu.core_type<tc>, window_params = [{transform_indices = @transform_0, window_bounds = array<i64: 3>}, {pipeline_mode = #tpu.pipeline_mode<synchronous>, transform_indices = @transform_1, window_bounds = array<i64: 2, 1, 15, 26>}, {pipeline_mode = #tpu.pipeline_mode<synchronous>, transform_indices = @transform_2, window_bounds = array<i64: 2, 1, 15, 26>}]} {
    %c0 = arith.constant 0 : index
    %0 = memref.load %arg1[%c0] : memref<3xf32, #tpu.memory_space<smem>>
    %c1 = arith.constant 1 : index
    %1 = memref.load %arg1[%c1] : memref<3xf32, #tpu.memory_space<smem>>
    %c2 = arith.constant 2 : index
    %2 = memref.load %arg1[%c2] : memref<3xf32, #tpu.memory_space<smem>>
    %c0_0 = arith.constant 0 : index
    %c0_1 = arith.constant 0 : index
    %c0_2 = arith.constant 0 : index
    %c0_3 = arith.constant 0 : index
    %3 = vector.load %arg2[%c0_0, %c0_1, %c0_2, %c0_3] : memref<2x1x15x26xf32, #tpu.memory_space<vmem>>, vector<2x1x15x26xf32>
    %4 = vector.broadcast %0 : f32 to vector<2x1x15x26xf32>
    %5 = arith.mulf %3, %4 : vector<2x1x15x26xf32>
    %6 = vector.broadcast %1 : f32 to vector<2x1x15x26xf32>
    %7 = arith.addf %5, %6 : vector<2x1x15x26xf32>
    %8 = math.tanh %7 : vector<2x1x15x26xf32>
    %cst = arith.constant 8.100000e+01 : f32
    %9 = vector.broadcast %cst : f32 to vector<2x1x15x26xf32>
    %10 = arith.mulf %8, %9 : vector<2x1x15x26xf32>
    %11 = vector.broadcast %2 : f32 to vector<2x1x15x26xf32>
    %12 = arith.addf %10, %11 : vector<2x1x15x26xf32>
    %13 = arith.divf %12, %12 : vector<2x1x15x26xf32>
    %c0_4 = arith.constant 0 : index
    %c0_5 = arith.constant 0 : index
    %c0_6 = arith.constant 0 : index
    %c0_7 = arith.constant 0 : index
    %14 = vector.load %arg3[%c0_4, %c0_5, %c0_6, %c0_7] : memref<2x1x15x26xf32, #tpu.memory_space<vmem>>, vector<2x1x15x26xf32>
    tpu.vector_store %arg3[%c0_4, %c0_5, %c0_6, %c0_7], %13 {strides = array<i32>} : memref<2x1x15x26xf32, #tpu.memory_space<vmem>>, vector<2x1x15x26xf32>,
    return
  }
  func.func @transform_0(%arg0: i32) -> i32 {
    %c0_i32 = arith.constant 0 : i32
    %c0_i32_0 = arith.constant 0 : i32
    return %c0_i32 : i32
  }
  func.func @transform_1(%arg0: i32) -> (i32, i32, i32, i32) {
    %c0_i32 = arith.constant 0 : i32
    %c0_i32_0 = arith.constant 0 : i32
    %c0_i32_1 = arith.constant 0 : i32
    %c0_i32_2 = arith.constant 0 : i32
    %c0_i32_3 = arith.constant 0 : i32
    return %c0_i32, %c0_i32_0, %c0_i32_1, %c0_i32_2 : i32, i32, i32, i32
  }
  func.func @transform_2(%arg0: i32) -> (i32, i32, i32, i32) {
    %c0_i32 = arith.constant 0 : i32
    %c0_i32_0 = arith.constant 0 : i32
    %c0_i32_1 = arith.constant 0 : i32
    %c0_i32_2 = arith.constant 0 : i32
    %c0_i32_3 = arith.constant 0 : i32
    return %c0_i32, %c0_i32_0, %c0_i32_1, %c0_i32_2 : i32, i32, i32, i32
  }
}

</mosaic_0001>

<bundles_post_ra>
// kernel: tpu_custom_call.1
= control target key start
LH: loop header
LB: loop body
LE: loop exit
PB: predicated region body
PF: predicated region fallthrough
CT: control target
= control target key end

     0   :  { %7 = vsyncpa [#allocation3], 0  ;;  %s149_s0 = inlined_call_operand.vmem [shape: f32[3], index: 0, kind: input, shape index: {}]   ;;  %s150_s1 = inlined_call_operand.vmem [shape: f32[2,1,15,26], index: 1, kind: input, shape index: {}]   ;;  %s151_s2 = inlined_call_operand.vmem [shape: f32[2,1,15,26], index: 2, kind: output, shape index: {}]  }
   0x1   :  { %s14_s11 = sshll.u32 %s149_s0, 4  ;;  %s15_s11 = int_to_ptr.vmem [resolvable:$true] %s14_s11 }
   0x2   :  { %s92_s12 = scalar_lea.vmem %s15_s11, 16  ;;  %p97_p1 = scmp.lt.s32.totalorder %s15_s11, %s15_s11 }
   0x3   :  { %p93_p0 = scmp.ne.s32.totalorder %s15_s11, %s92_s12  ;;  %p98_p2 = scmp.lt.s32.totalorder %s92_s12, %s92_s12 }
   0x5   :  { %p99_p3 = por %p98_p2, %p97_p1 }
   0x7   :  { %p100_p4 = pnand %p99_p3, %p93_p0 }
   0x9   :  { %103 = shalt.err (!%p100_p4)
}
   0xa   :  { %s106_s13 = smov [#allocation2]  }
   0xb   :  { %17 = dma.vmem_to_smem %s15_s11, 16, %s106_s13, [#allocation3]  }
   0xc   :  { %104 = dma.done.wait [#allocation3], 16  }
   0xd   :  { %105 = vsyncadd [#allocation3], 4294967280 }
   0xe   :  { %23 = sfence }
   0xf   :  { %s24_s14 = sld [smem:[#allocation2]]  ;;  %v27_v0 = vld [vmem:[%s150_s1] sm:$0xff]  ;;  %v28_v1 = vld [vmem:[%s150_s1 + $0x8] sm:$0x7f]  ;;  %v29_v2 = vld [vmem:[%s150_s1 + $0x10] sm:$0xff]  ;;  %vm62_vm0 = vcmask 211968  }
  0x10   :  { %s73_s15 = sld [smem:[#allocation2 + $0x1]]  ;;  %v30_v3 = vld [vmem:[%s150_s1 + $0x18] sm:$0x7f]  ;;  %vm64_vm1 = vcmask 210944  }
  0x11   :  { %s74_s23 = sld [smem:[#allocation2 + $0x2]] }
  0x15   :  { %v31_v4 = vstv %s24_s14 }
  0x16   :  { %v32_v5 = vmul.f32 %v31_v4, %v27_v0  ;;  %v36_v6 = vstv %s73_s15  ;;  %v33_v7 = vmul.f32 %v31_v4, %v28_v1  ;;  %v34_v8 = vmul.f32 %v31_v4, %v29_v2 }
  0x17   :  { %v35_v9 = vmul.f32 %v31_v4, %v30_v3  ;;  %v49_v15 = vstv %s74_s23 }
  0x18   :  { %v37_v10 = vadd.f32 %v36_v6, %v32_v5  ;;  %v38_v11 = vadd.f32 %v36_v6, %v33_v7  ;;  %v39_v12 = vadd.f32 %v36_v6, %v34_v8 }
  0x19   :  { %v40_v13 = vadd.f32 %v36_v6, %v35_v9 }
  0x1a   :  { %76 = vtanh.f32 %v37_v10 }
  0x1b   :  { %78 = vtanh.f32 %v38_v11 }
  0x1c   :  { %80 = vtanh.f32 %v39_v12 }
  0x1d   :  { %82 = vtanh.f32 %v40_v13 }
  0x27   :  { %v77_v14 = vpop.eup %76 }
  0x28   :  { %v79_v16 = vpop.eup %78  ;;  %v45_v17 = vmul.f32 81.0, %v77_v14 }
  0x29   :  { %v81_v18 = vpop.eup %80  ;;  %v46_v19 = vmul.f32 81.0, %v79_v16 }
  0x2a   :  { %v83_v20 = vpop.eup %82  ;;  %v50_v21 = vadd.f32 %v49_v15, %v45_v17  ;;  %v47_v22 = vmul.f32 81.0, %v81_v18 }
  0x2b   :  { %v51_v23 = vadd.f32 %v49_v15, %v46_v19  ;;  %v48_v24 = vmul.f32 81.0, %v83_v20 }
  0x2c   :  { %84 = vrcp.f32 %v50_v21  ;;  %v52_v25 = vadd.f32 %v49_v15, %v47_v22 }
  0x2d   :  { %86 = vrcp.f32 %v51_v23  ;;  %v53_v26 = vadd.f32 %v49_v15, %v48_v24 }
  0x2e   :  { %88 = vrcp.f32 %v52_v25 }
  0x2f   :  { %90 = vrcp.f32 %v53_v26 }
  0x39   :  { %v85_v27 = vpop.eup %84 }
  0x3a   :  { %v87_v28 = vpop.eup %86  ;;  %v55_v29 = vmul.f32 %v85_v27, %v50_v21 }
  0x3b   :  { %v89_v30 = vpop.eup %88  ;;  %v57_v31 = vmul.f32 %v87_v28, %v51_v23 }
  0x3c   :  { %v91_v32 = vpop.eup %90  ;;  %63 = vst.msk [vmem:[%s151_s2] sm:$0xff] %vm62_vm0, %v55_v29  ;;  %v59_v33 = vmul.f32 %v89_v30, %v52_v25 }
  0x3d   :  { %65 = vst.msk [vmem:[%s151_s2 + $0x8] sm:$0x7f] %vm64_vm1, %v57_v31  ;;  %v61_v34 = vmul.f32 %v91_v32, %v53_v26 }
  0x3e   :  { %66 = vst.msk [vmem:[%s151_s2 + $0x10] sm:$0xff] %vm62_vm0, %v59_v33 }
  0x3f   :  { %67 = vst.msk [vmem:[%s151_s2 + $0x18] sm:$0x7f] %vm64_vm1, %v61_v34 }
  0x40   :  { %72 = vsyncpa [#allocation3], 1 }

</bundles_post_ra>
